<compile_context>
chip_gen: v7x
topology: tpu7x:2x2x1
jax: 0.10.0
libtpu: 0.0.40
codegen_flags: <defaults>
</compile_context>

<pallas_src>
import math
from functools import partial

import numpy as np
import jax
import jax.numpy as jnp
from jax import lax
from jax.experimental import pallas as pl
from jax.experimental.pallas import tpu as pltpu

LANE = 128


# ------------------------------ small helpers -------------------------------

def _round_up(x, m):
    return ((x + m - 1) // m) * m


def _pad_last(x, target):
    pad = target - x.shape[-1]
    if pad == 0:
        return x
    return jnp.pad(x, [(0, 0)] * (x.ndim - 1) + [(0, pad)])


def _pick_row_tile(h, w, target_rows=1024):
    """Largest divisor th of h with th*w <= target_rows and th*w % 16 == 0."""
    upper = min(h, max(1, target_rows // max(w, 1)))
    for th in range(upper, 0, -1):
        if h % th == 0 and (th * w) % 16 == 0:
            return th
    return h


_VMEM_LIMIT = [None]


def _vmem_limit_bytes():
    """Per-generation scoped-VMEM budget: ~75% of capacity (32 MiB fallback)."""
    if _VMEM_LIMIT[0] is None:
        limit = 32 * 1024 * 1024
        try:
            cap = getattr(pltpu.get_tpu_info(), "vmem_capacity_bytes", None)
            if cap:
                limit = int(min(96 * 1024 * 1024,
                                max(32 * 1024 * 1024, (cap * 3) // 4)))
        except Exception:
            pass
        _VMEM_LIMIT[0] = limit
    return _VMEM_LIMIT[0]


def _compiler_params(sem):
    return pltpu.CompilerParams(dimension_semantics=sem,
                                vmem_limit_bytes=_vmem_limit_bytes())


# ------------------------------ Pallas kernels -------------------------------

def _mm_bias_kernel(x_ref, w_ref, b_ref, o_ref):
    """Row-tiled (bm, K) @ (K, N) + bias(1, N); bf16 operands, f32 accumulate."""
    acc = jnp.dot(x_ref[...], w_ref[...], preferred_element_type=jnp.float32)
    o_ref[...] = (acc + b_ref[...]).astype(o_ref.dtype)


def _rows_up_kernel(c_ref, ah_ref, o_ref):
    """Height (row) bilinear interp: (Ho, Hc) @ (Hc, Wc*Cp)."""
    o_ref[0] = jnp.dot(ah_ref[...], c_ref[0],
                       preferred_element_type=jnp.float32).astype(o_ref.dtype)


def _merge_kernel(t_ref, aw_ref, x_ref, w_ref, b_ref, o_ref, *, wo):
    """Fused: lateral 1x1 conv + column bilinear interp of the coarser map + add."""
    _, th, wc, cp = t_ref.shape
    lat = jnp.dot(x_ref[0], w_ref[...],
                  preferred_element_type=jnp.float32) + b_ref[...]
    awb = jnp.broadcast_to(aw_ref[...][None], (th, wo, wc))        # (th, Wo, Wc) bf16
    up = lax.dot_general(awb, t_ref[0],
                         dimension_numbers=(((2,), (1,)), ((0,), (0,))),
                         preferred_element_type=jnp.float32)       # (th, Wo, Cp)
    o_ref[0] = (lat + up.reshape(th * wo, cp)).astype(o_ref.dtype)


def _conv3x3_kernel(x_ref, w_ref, b_ref, o_ref, xp_ref, *, h, w):
    """3x3 conv (pad=1) on one feature map; zero border kept in a VMEM scratch.

    Taps are grouped per kernel row (K = 3*Cp) to keep the MXU contraction deep.
    """
    cp = x_ref.shape[-1]
    xp_ref[...] = jnp.zeros_like(xp_ref)
    xp_ref[1:h + 1, 1:w + 1, :] = x_ref[0]
    acc = jnp.zeros((h * w, o_ref.shape[-1]), jnp.float32)
    for kh in range(3):
        taps = [xp_ref[kh:kh + h, kw:kw + w, :].reshape(h * w, cp)
                for kw in range(3)]
        cat = jnp.concatenate(taps, axis=-1)                       # (h*w, 3*Cp)
        acc = acc + jnp.dot(cat, w_ref[kh], preferred_element_type=jnp.float32)
    o_ref[0] = (acc + b_ref[...]).astype(o_ref.dtype)


def _fusion_cls_kernel(*refs, n_coarse, th, w0, wcs, cp):
    """Fused multi-scale fusion (VMEM-resident accumulator) + 1x1 classifier."""
    out0_ref = refs[0]
    wcls_ref = refs[1 + 2 * n_coarse]
    bcls_ref = refs[2 + 2 * n_coarse]
    o_ref = refs[3 + 2 * n_coarse]
    acc = out0_ref[0].astype(jnp.float32)                          # (th*W0, Cp)
    for l in range(n_coarse):
        t_ref = refs[1 + 2 * l]
        aw_ref = refs[2 + 2 * l]
        wc = wcs[l]
        awb = jnp.broadcast_to(aw_ref[...][None], (th, w0, wc))
        up = lax.dot_general(awb, t_ref[0],
                             dimension_numbers=(((2,), (1,)), ((0,), (0,))),
                             preferred_element_type=jnp.float32)   # (th, W0, Cp)
        acc = acc + up.reshape(th * w0, cp)
    # Dropout2d is identity at inference time.
    logits = jnp.dot(acc.astype(jnp.bfloat16), wcls_ref[...],
                     preferred_element_type=jnp.float32) + bcls_ref[...]
    o_ref[0] = logits.astype(o_ref.dtype)


# ------------------------------ kernel wrappers -------------------------------

def conv1x1_rows(x2d, wm, bv, out_dtype=jnp.bfloat16, block_rows=512):
    """1x1 conv as a row-tiled matmul: (M, K) @ (K, N) + bias."""
    m, k = x2d.shape
    n = wm.shape[1]
    bm = min(block_rows, _round_up(m, 16))
    mp = _round_up(m, bm)
    xp = jnp.pad(x2d, ((0, mp - m), (0, 0))) if mp != m else x2d
    out = pl.pallas_call(
        _mm_bias_kernel,
        out_shape=jax.ShapeDtypeStruct((mp, n), out_dtype),
        grid=(mp // bm,),
        in_specs=[pl.BlockSpec((bm, k), lambda i: (i, 0)),
                  pl.BlockSpec((k, n), lambda i: (0, 0)),
                  pl.BlockSpec((1, n), lambda i: (0, 0))],
        out_specs=pl.BlockSpec((bm, n), lambda i: (i, 0)),
        compiler_params=_compiler_params(("parallel",)),
    )(xp, wm, bv)
    return out[:m] if mp != m else out


def rows_upsample(coarse2d, ah, wc):
    """Height interp: (N, Hc*Wc, Cp) bf16 -> (N, Ho, Wc, Cp) bf16."""
    n_b, hw, cp = coarse2d.shape
    hc = hw // wc
    ho = ah.shape[0]
    c3 = coarse2d.reshape(n_b, hc, wc * cp)                  # free XLA reshape
    out = pl.pallas_call(
        _rows_up_kernel,
        out_shape=jax.ShapeDtypeStruct((n_b, ho, wc * cp), jnp.bfloat16),
        grid=(n_b,),
        in_specs=[pl.BlockSpec((1, hc, wc * cp), lambda b: (b, 0, 0)),
                  pl.BlockSpec((ho, hc), lambda b: (0, 0))],
        out_specs=pl.BlockSpec((1, ho, wc * cp), lambda b: (b, 0, 0)),
        compiler_params=_compiler_params(("parallel",)),
    )(c3, ah)
    return out.reshape(n_b, ho, wc, cp)                      # free XLA reshape


def merge_cols_lateral(t4, aw, feat2d, wm, bv, ho, wo):
    """merged[b] = lateral(feat)[b] + column-interp(t4)[b]; row-tiled over height."""
    n_b, _, wc, cp = t4.shape
    cin = feat2d.shape[-1]
    th = _pick_row_tile(ho, wo)
    return pl.pallas_call(
        partial(_merge_kernel, wo=wo),
        out_shape=jax.ShapeDtypeStruct((n_b, ho * wo, cp), jnp.bfloat16),
        grid=(n_b, ho // th),
        in_specs=[pl.BlockSpec((1, th, wc, cp), lambda b, i: (b, i, 0, 0)),
                  pl.BlockSpec((wo, wc), lambda b, i: (0, 0)),
                  pl.BlockSpec((1, th * wo, cin), lambda b, i: (b, i, 0)),
                  pl.BlockSpec((cin, cp), lambda b, i: (0, 0)),
                  pl.BlockSpec((1, cp), lambda b, i: (0, 0))],
        out_specs=pl.BlockSpec((1, th * wo, cp), lambda b, i: (b, i, 0)),
        compiler_params=_compiler_params(("parallel", "parallel")),
    )(t4, aw, feat2d, wm, bv)


def conv3x3(x2d, wm, bv, h, w):
    """3x3 conv, padding=1. x2d (N, h*w, Cp) bf16; wm (3, 3*Cp, Coutp) bf16."""
    n_b, hw, cp = x2d.shape
    coutp = wm.shape[-1]
    x4 = x2d.reshape(n_b, h, w, cp)                          # free XLA reshape
    return pl.pallas_call(
        partial(_conv3x3_kernel, h=h, w=w),
        out_shape=jax.ShapeDtypeStruct((n_b, hw, coutp), jnp.bfloat16),
        grid=(n_b,),
        in_specs=[pl.BlockSpec((1, h, w, cp), lambda b: (b, 0, 0, 0)),
                  pl.BlockSpec((3, 3 * cp, coutp), lambda b: (0, 0, 0)),
                  pl.BlockSpec((1, coutp), lambda b: (0, 0))],
        out_specs=pl.BlockSpec((1, hw, coutp), lambda b: (b, 0, 0)),
        scratch_shapes=[pltpu.VMEM((h + 2, w + 2, cp), jnp.bfloat16)],
        compiler_params=_compiler_params(("parallel",)),
    )(x4, wm, bv)


def fusion_classifier(out0, t_list, aw_list, wc_list, wcls, bcls, h0, w0):
    """fusion = out0 + sum_i col-interp(t_i);  logits = fusion @ wcls + bcls."""
    n_b, hw0, cp = out0.shape
    clsp = wcls.shape[1]
    n_coarse = len(t_list)
    th = _pick_row_tile(h0, w0)
    args = [out0]
    in_specs = [pl.BlockSpec((1, th * w0, cp), lambda b, i: (b, i, 0))]
    for t4, aw, wc in zip(t_list, aw_list, wc_list):
        in_specs.append(pl.BlockSpec((1, th, wc, cp), lambda b, i: (b, i, 0, 0)))
        in_specs.append(pl.BlockSpec((w0, wc), lambda b, i: (0, 0)))
        args.extend([t4, aw])
    in_specs.append(pl.BlockSpec((cp, clsp), lambda b, i: (0, 0)))
    in_specs.append(pl.BlockSpec((1, clsp), lambda b, i: (0, 0)))
    args.extend([wcls, bcls])
    kernel = partial(_fusion_cls_kernel, n_coarse=n_coarse, th=th, w0=w0,
                     wcs=tuple(wc_list), cp=cp)
    return pl.pallas_call(
        kernel,
        out_shape=jax.ShapeDtypeStruct((n_b, hw0, clsp), jnp.float32),
        grid=(n_b, h0 // th),
        in_specs=in_specs,
        out_specs=pl.BlockSpec((1, th * w0, clsp), lambda b, i: (b, i, 0)),
        compiler_params=_compiler_params(("parallel", "parallel")),
    )(*args)


# --------------------- bilinear interpolation (PyTorch) ----------------------

def _interp_matrix(out_size, in_size):
    """1-D matrix reproducing F.interpolate(mode='bilinear', align_corners=False)."""
    scale = in_size / out_size
    mat = np.zeros((out_size, in_size), dtype=np.float32)
    for o in range(out_size):
        src = (o + 0.5) * scale - 0.5
        src = max(src, 0.0)
        i0 = min(int(math.floor(src)), in_size - 1)
        i1 = min(i0 + 1, in_size - 1)
        w1 = src - i0
        mat[o, i0] += 1.0 - w1
        mat[o, i1] += w1
    return mat


def _interp_bf16(out_size, in_size):
    return jnp.asarray(_interp_matrix(out_size, in_size), dtype=jnp.bfloat16)


# ------------------------------- FPNHead fwd ---------------------------------

def fpn_head_forward(features_nhwc, params):
    """features_nhwc: list of (N,H,W,C) f32 maps, highest resolution first.

    Returns (N, H0, W0, Clsp) f32 logits, class dim zero-padded to 128 lanes
    (caller slices to num_classes).
    """
    nlev = len(features_nhwc)
    n_b = features_nhwc[0].shape[0]
    sizes = [(f.shape[1], f.shape[2]) for f in features_nhwc]
    cp = params["lateral"][0][0].shape[1]          # padded out_channels

    # Channels padded to lane width, cast to bf16, spatial flattened to rows.
    feats2d = []
    for f in features_nhwc:
        n, h, w, c = f.shape
        fp = _pad_last(f, _round_up(c, LANE)).astype(jnp.bfloat16)
        feats2d.append(fp.reshape(n, h * w, -1))

    # ---- top-down pathway ----
    merged = [None] * nlev
    wm, bv = params["lateral"][-1]
    h, w = sizes[-1]
    lat = conv1x1_rows(feats2d[-1].reshape(n_b * h * w, -1), wm, bv)
    merged[-1] = lat.reshape(n_b, h * w, cp)
    for i in range(nlev - 2, -1, -1):
        hi, wi = sizes[i]
        hc, wc = sizes[i + 1]
        t4 = rows_upsample(merged[i + 1], _interp_bf16(hi, hc), wc)
        wm, bv = params["lateral"][i]
        merged[i] = merge_cols_lateral(t4, _interp_bf16(wi, wc),
                                       feats2d[i], wm, bv, hi, wi)

    # ---- 3x3 FPN convs ----
    outs = []
    for i in range(nlev):
        hi, wi = sizes[i]
        wm, bv = params["fpn"][i]
        outs.append(conv3x3(merged[i], wm, bv, hi, wi))

    # ---- multi-scale fusion + Dropout2d (identity at eval) + classifier ----
    h0, w0 = sizes[0]
    t_list, aw_list, wc_list = [], [], []
    for i in range(1, nlev):
        hi, wi = sizes[i]
        t_list.append(rows_upsample(outs[i], _interp_bf16(h0, hi), wi))
        aw_list.append(_interp_bf16(w0, wi))
        wc_list.append(wi)
    wcls, bcls = params["classifier"]
    seg = fusion_classifier(outs[0], t_list, aw_list, wc_list, wcls, bcls, h0, w0)
    return seg.reshape(n_b, h0, w0, -1)


# ------------------------------ param handling --------------------------------

def init_params(key, in_channels_list, out_channels, num_classes):
    """Torch-layout parameters (Cout, Cin, kh, kw) / (Cout,), f32."""
    params = {"lateral": [], "fpn": []}
    for in_ch in in_channels_list:
        key, k1, k2 = jax.random.split(key, 3)
        w = jax.random.normal(k1, (out_channels, in_ch, 1, 1), jnp.float32) * 0.1
        b = jax.random.normal(k2, (out_channels,), jnp.float32) * 0.01
        params["lateral"].append((w, b))
    for _ in in_channels_list:
        key, k1, k2 = jax.random.split(key, 3)
        w = jax.random.normal(k1, (out_channels, out_channels, 3, 3), jnp.float32) * 0.05
        b = jax.random.normal(k2, (out_channels,), jnp.float32) * 0.01
        params["fpn"].append((w, b))
    key, k1, k2 = jax.random.split(key, 3)
    w = jax.random.normal(k1, (num_classes, out_channels, 1, 1), jnp.float32) * 0.1
    b = jax.random.normal(k2, (num_classes,), jnp.float32) * 0.01
    params["classifier"] = (w, b)
    return params


def prepare_params(raw):
    """Convert torch-layout params to padded, lane-dense, bf16 kernel layout."""
    def pad1x1(w, b):
        cout, cin = w.shape[0], w.shape[1]
        cinp, coutp = _round_up(cin, LANE), _round_up(cout, LANE)
        wm = jnp.transpose(w.reshape(cout, cin), (1, 0))              # (Cin, Cout)
        wm = jnp.pad(wm, ((0, cinp - cin), (0, coutp - cout))).astype(jnp.bfloat16)
        bv = jnp.pad(b, (0, coutp - cout)).reshape(1, -1).astype(jnp.float32)
        return wm, bv

    prepped = {"lateral": [pad1x1(w, b) for (w, b) in raw["lateral"]], "fpn": []}
    for (w, b) in raw["fpn"]:
        cout, cin = w.shape[0], w.shape[1]
        cinp, coutp = _round_up(cin, LANE), _round_up(cout, LANE)
        wt = jnp.transpose(w, (2, 3, 1, 0))                           # (kh,kw,Cin,Cout)
        wt = jnp.pad(wt, ((0, 0), (0, 0), (0, cinp - cin), (0, coutp - cout)))
        wm = wt.reshape(3, 3 * cinp, coutp).astype(jnp.bfloat16)      # row-grouped taps
        bv = jnp.pad(b, (0, coutp - cout)).reshape(1, -1).astype(jnp.float32)
        prepped["fpn"].append((wm, bv))
    prepped["classifier"] = pad1x1(*raw["classifier"])
    return prepped


# ----------------------------------- main -------------------------------------

if __name__ == "__main__":
    key = jax.random.PRNGKey(0)

    batch = 2
    in_channels_list = [4, 8, 16]
    spatial_sizes = [16, 8, 4]
    out_channels = 8
    num_classes = 3

    # NCHW inputs, matching the PyTorch module's convention.
    features_nchw = []
    for c, s in zip(in_channels_list, spatial_sizes):
        key, k = jax.random.split(key)
        features_nchw.append(jax.random.normal(k, (batch, c, s, s), jnp.float32))

    key, kparam = jax.random.split(key)
    raw_params = init_params(kparam, in_channels_list, out_channels, num_classes)
    params = prepare_params(raw_params)

    # NCHW -> NHWC for the kernels.
    features_nhwc = [jnp.transpose(f, (0, 2, 3, 1)) for f in features_nchw]

    seg_padded = fpn_head_forward(features_nhwc, params)      # (N, H0, W0, 128) f32
    seg_nhwc = seg_padded[..., :num_classes]
    seg_nchw = jnp.transpose(seg_nhwc, (0, 3, 1, 2))           # back to torch layout
    seg_nchw = jax.block_until_ready(seg_nchw)

    expected_shape = (batch, num_classes, spatial_sizes[0], spatial_sizes[0])
    assert seg_nchw.shape == expected_shape, seg_nchw.shape
    assert bool(jnp.all(jnp.isfinite(seg_nchw)))

    print("KERNEL_OK")
</pallas_src>

<mosaic_0001>
module attributes {stable_mosaic.version = 11 : i64} {
  func.func @_mm_bias_kernel(%arg0: i32, %arg1: memref<32x128xbf16, #tpu.memory_space<vmem>>, %arg2: memref<128x128xbf16, #tpu.memory_space<vmem>>, %arg3: memref<1x128xf32, #tpu.memory_space<vmem>>, %arg4: memref<32x128xbf16, #tpu.memory_space<vmem>>) attributes {dimension_semantics = [#tpu.dimension_semantics<parallel>], iteration_bounds = array<i64: 1>, scalar_prefetch = 0 : i64, scratch_operands = 0 : i64, tpu.core_type = #tpu.core_type<tc>, window_params = [{transform_indices = @transform_0, window_bounds = array<i64: 32, 128>}, {pipeline_mode = #tpu.pipeline_mode<synchronous>, transform_indices = @transform_1, window_bounds = array<i64: 128, 128>}, {pipeline_mode = #tpu.pipeline_mode<synchronous>, transform_indices = @transform_2, window_bounds = array<i64: 1, 128>}, {transform_indices = @transform_3, window_bounds = array<i64: 32, 128>}]} {
    %c0 = arith.constant 0 : index
    %c0_0 = arith.constant 0 : index
    %0 = vector.load %arg1[%c0, %c0_0] : memref<32x128xbf16, #tpu.memory_space<vmem>>, vector<32x128xbf16>
    %c0_1 = arith.constant 0 : index
    %c0_2 = arith.constant 0 : index
    %1 = vector.load %arg2[%c0_1, %c0_2] : memref<128x128xbf16, #tpu.memory_space<vmem>>, vector<128x128xbf16>
    %cst = arith.constant dense<0.000000e+00> : vector<32x128xf32>
    %2 = tpu.matmul %0, %1, %cst {dimension_numbers = #tpu.dot_dimension_numbers<[1], [0], [0], [1], [0, 0, 1, 1], [], []>} : vector<32x128xbf16>, vector<128x128xbf16>, vector<32x128xf32> -> vector<32x128xf32>
    %c0_3 = arith.constant 0 : index
    %c0_4 = arith.constant 0 : index
    %3 = vector.load %arg3[%c0_3, %c0_4] : memref<1x128xf32, #tpu.memory_space<vmem>>, vector<1x128xf32>
    %4 = vector.broadcast %3 : vector<1x128xf32> to vector<32x128xf32>
    %5 = arith.addf %2, %4 : vector<32x128xf32>
    %6 = arith.truncf %5 : vector<32x128xf32> to vector<32x128xbf16>
    %c0_5 = arith.constant 0 : index
    %c0_6 = arith.constant 0 : index
    %7 = vector.load %arg4[%c0_5, %c0_6] : memref<32x128xbf16, #tpu.memory_space<vmem>>, vector<32x128xbf16>
    tpu.vector_store %arg4[%c0_5, %c0_6], %6 {strides = array<i32>} : memref<32x128xbf16, #tpu.memory_space<vmem>>, vector<32x128xbf16>,
    return
  }
  func.func @transform_0(%arg0: i32) -> (i32, i32) {
    %c0_i32 = arith.constant 0 : i32
    %c0_i32_0 = arith.constant 0 : i32
    return %arg0, %c0_i32 : i32, i32
  }
  func.func @transform_1(%arg0: i32) -> (i32, i32) {
    %c0_i32 = arith.constant 0 : i32
    %c0_i32_0 = arith.constant 0 : i32
    %c0_i32_1 = arith.constant 0 : i32
    return %c0_i32, %c0_i32_0 : i32, i32
  }
  func.func @transform_2(%arg0: i32) -> (i32, i32) {
    %c0_i32 = arith.constant 0 : i32
    %c0_i32_0 = arith.constant 0 : i32
    %c0_i32_1 = arith.constant 0 : i32
    return %c0_i32, %c0_i32_0 : i32, i32
  }
  func.func @transform_3(%arg0: i32) -> (i32, i32) {
    %c0_i32 = arith.constant 0 : i32
    %c0_i32_0 = arith.constant 0 : i32
    return %arg0, %c0_i32 : i32, i32
  }
}

</mosaic_0001>

<bundles_post_ra>
// kernel: tpu_custom_call.1
= control target key start
LH: loop header
LB: loop body
LE: loop exit
PB: predicated region body
PF: predicated region fallthrough
CT: control target
= control target key end

     0   :  { %8 = vsyncpa [#allocation3], 0  ;;  %s438_s0 = inlined_call_operand.hbm [shape: bf16[32,128], index: 0, kind: input, shape index: {}]   ;;  %s439_s1 = inlined_call_operand.hbm [shape: bf16[128,128], index: 1, kind: input, shape index: {}]   ;;  %s440_s2 = inlined_call_operand.vmem [shape: f32[1,128], index: 2, kind: input, shape index: {}]   ;;  %s441_s3 = inlined_call_operand.hbm [shape: bf16[32,128], index: 3, kind: output, shape index: {}]  }
   0x1   :  { %9 = vsyncpa [#allocation6], 0 }
   0x2   :  { %10 = vsyncpa [#allocation4], 0  ;;  %s365_s12 = smov [#allocation2]   ;;  %s293_s16 = scalar_lea.hbm %s438_s0, 256 }
   0x3   :  { %s16_s13 = sshll.u32 %s365_s12, 4  ;;  %p294_p0 = scmp.ne.s32.totalorder %s438_s0, %s293_s16  ;;  %s17_s13 = int_to_ptr.vmem [resolvable:$true] %s16_s13 }
   0x4   :  { %p297_p1 = scmp.lt.u32.totalorder %s293_s16, %s438_s0 }
   0x6   :  { %p299_p2 = pnand %p297_p1, %p294_p0 }
   0x8   :  { %302 = shalt.err (!%p299_p2)
}
   0x9   :  { %s303_s21 = scalar_lea.vmem %s17_s13, 256  ;;  %p308_p4 = scmp.lt.s32.totalorder %s17_s13, %s17_s13 }
   0xa   :  { %p304_p3 = scmp.ne.s32.totalorder %s17_s13, %s303_s21  ;;  %p309_p5 = scmp.lt.s32.totalorder %s303_s21, %s303_s21 }
   0xc   :  { %p310_p6 = por %p309_p5, %p308_p4 }
   0xe   :  { %p311_p7 = pnand %p310_p6, %p304_p3 }
  0x10   :  { %314 = shalt.err (!%p311_p7)
}
  0x11   :  { %s366_s22 = smov 64   ;;  %s367_s23 = smov 4  }
  0x12   :  { %22 = dma.hbm_to_vmem [thread:$0]  %s438_s0, 256, %s17_s13, [#allocation3], %s366_s22, %s366_s22, %s367_s23  }
  0x13   :  { %s368_s26 = smov [#allocation5]   ;;  %s315_s30 = scalar_lea.hbm %s439_s1, 1024 }
  0x14   :  { %s28_s27 = sshll.u32 %s368_s26, 4  ;;  %p316_p8 = scmp.ne.s32.totalorder %s439_s1, %s315_s30  ;;  %s29_s27 = int_to_ptr.vmem [resolvable:$true] %s28_s27 }
  0x15   :  { %p319_p9 = scmp.lt.u32.totalorder %s315_s30, %s439_s1 }
  0x17   :  { %p321_p10 = pnand %p319_p9, %p316_p8 }
  0x19   :  { %324 = shalt.err (!%p321_p10)
}
  0x1a   :  { %s325_s8 = scalar_lea.vmem %s29_s27, 1024  ;;  %p330_p12 = scmp.lt.s32.totalorder %s29_s27, %s29_s27 }
  0x1b   :  { %p326_p11 = scmp.ne.s32.totalorder %s29_s27, %s325_s8  ;;  %p331_p13 = scmp.lt.s32.totalorder %s325_s8, %s325_s8 }
  0x1d   :  { %p332_p0 = por %p331_p13, %p330_p12 }
  0x1f   :  { %p333_p1 = pnand %p332_p0, %p326_p11 }
  0x21   :  { %336 = shalt.err (!%p333_p1)
}
  0x22   :  { %34 = dma.hbm_to_vmem [thread:$0]  %s439_s1, 1024, %s29_s27, [#allocation6], %s366_s22, %s366_s22, %s367_s23  }
  0x23   :  { %359 = dma.done.wait [#allocation3], 256  }
  0x24   :  { %360 = vsyncadd [#allocation3], 4294967040 }
  0x25   :  { %361 = dma.done.wait [#allocation6], 1024  }
  0x26   :  { %362 = vsyncadd [#allocation6], 4294966272  ;;  %v283_v0 = vld [vmem:[#allocation5] sm:$0xff]   ;;  %v284_v1 = vld [vmem:[#allocation5 + $0x8] sm:$0xff]   ;;  %s369_s11 = smov [#allocation7]  }
  0x27   :  { %258 = vmatprep.subr.bf16.mxu0 %v283_v0  ;;  %v285_v2 = vld [vmem:[#allocation5 + $0x10] sm:$0xff]   ;;  %v286_v3 = vld [vmem:[#allocation5 + $0x18] sm:$0xff]   ;;  %v287_v5 = vld [vmem:[#allocation5 + $0x20] sm:$0xff]   ;;  %s205_s12 = sshll.u32 %s369_s11, 4  ;;  %s206_s12 = int_to_ptr.vmem [resolvable:$true] %s205_s12 }
  0x28   :  { %259 = vmatpush3.bf16.msra.mxu0 %v283_v0  ;;  %v291_v4 = vld [vmem:[#allocation2] sm:$0xff]   ;;  %v288_v6 = vld [vmem:[#allocation5 + $0x28] sm:$0xff]   ;;  %v290_v8 = vld [vmem:[#allocation5 + $0x38] sm:$0xff]   ;;  %s337_s13 = scalar_lea.vmem %s206_s12, 256  ;;  %p342_p3 = scmp.lt.s32.totalorder %s206_s12, %s206_s12 }
  0x29   :  { %260 = vmatprep.subr.bf16.mxu0 %v284_v1  ;;  %274 = vmatprep.mubr.bf16.mxu0 %v291_v4  ;;  %v289_v7 = vld [vmem:[#allocation5 + $0x30] sm:$0xff]   ;;  %v292_v9 = vld [vmem:[#allocation2 + $0x8] sm:$0xff]   ;;  %p338_p2 = scmp.ne.s32.totalorder %s206_s12, %s337_s13  ;;  %p343_p4 = scmp.lt.s32.totalorder %s337_s13, %s337_s13 }
  0x2a   :  { %v218_v11 = vld [vmem:[%s440_s2] ss:$0 sm:$0xff] }
  0x2b   :  { %p344_p5 = por %p343_p4, %p342_p3 }
  0x2c   :  { %261 = vmatpush3.bf16.msra.mxu0 %v284_v1 }
  0x2d   :  { %262 = vmatprep.subr.bf16.mxu0 %v285_v2  ;;  %p345_p6 = pnand %p344_p5, %p338_p2 }
  0x30   :  { %263 = vmatpush3.bf16.msra.mxu0 %v285_v2 }
  0x31   :  { %264 = vmatprep.subr.bf16.mxu0 %v286_v3 }
  0x34   :  { %265 = vmatpush3.bf16.msra.mxu0 %v286_v3 }
  0x35   :  { %266 = vmatprep.subr.bf16.mxu0 %v287_v5 }
  0x38   :  { %267 = vmatpush3.bf16.msra.mxu0 %v287_v5 }
  0x39   :  { %268 = vmatprep.subr.bf16.mxu0 %v288_v6 }
  0x3c   :  { %269 = vmatpush3.bf16.msra.mxu0 %v288_v6 }
  0x3d   :  { %270 = vmatprep.subr.bf16.mxu0 %v289_v7 }
  0x40   :  { %271 = vmatpush3.bf16.msra.mxu0 %v289_v7 }
  0x41   :  { %272 = vmatprep.subr.bf16.mxu0 %v290_v8 }
  0x44   :  { %273 = vmatpush3.bf16.msra.mxu0 %v290_v8 }
  0x47   :  { %275 = vmatmul.mubr.bf16.vlgmr.msra.gmra.mrb[0].mxu0 %v292_v9 }
 0x11a   :  { %v276_v10 = vpop.f32.mrb[0].mxu0 }
 0x11b   :  { %v165_v12 = vpop.f32.mrb[1].mxu0  ;;  %v174_v14 = vadd.f32 %v276_v10, %v218_v11 }
 0x11c   :  { %v277_v13 = vpop.f32.mrb[2].mxu0  ;;  %v166_v17 = vadd.f32 %v218_v11, %v165_v12 }
 0x11d   :  { %v177_v15 = vadd.f32 %v277_v13, %v218_v11  ;;  %v168_v16 = vpop.f32.mrb[3].mxu0 }
 0x11e   :  { %v169_v18 = vadd.f32 %v218_v11, %v168_v16 }
 0x11f   :  { %v245_v19 = vpack.c.bf16 %v177_v15, %v174_v14 }
 0x120   :  { %v240_v20 = vpack.c.bf16 %v169_v18, %v166_v17 }
 0x121   :  { %247 = vst [vmem:[#allocation7 + $0x8] sm:$0xff] %v245_v19  }
 0x122   :  { %241 = vst [vmem:[#allocation7] sm:$0xff] %v240_v20  }
 0x123   :  { %348 = shalt.err (!%p345_p6)
}
 0x124   :  { %s349_s15 = scalar_lea.hbm %s441_s3, 256 }
 0x125   :  { %p350_p7 = scmp.ne.s32.totalorder %s441_s3, %s349_s15  ;;  %p353_p8 = scmp.lt.u32.totalorder %s349_s15, %s441_s3 }
 0x127   :  { %p355_p9 = pnand %p353_p8, %p350_p7 }
 0x129   :  { %358 = shalt.err (!%p355_p9)
}
 0x12a   :  { %211 = dma.vmem_to_hbm [thread:$0]  %s206_s12, 256, %s441_s3, [#allocation4], %s366_s22, %s366_s22, %s367_s23  }
 0x12b   :  { %363 = dma.done.wait [#allocation4], 256  }
 0x12c   :  { %364 = vsyncadd [#allocation4], 4294967040 }
 0x12d   :  { %215 = vsyncpa [#allocation3], 1 }
 0x12e   :  { %216 = vsyncpa [#allocation6], 1 }
 0x12f   :  { %217 = vsyncpa [#allocation4], 1 }

</bundles_post_ra>
